<compile_context>
chip_gen: v7x
topology: tpu7x:2x2x1
jax: 0.10.0
libtpu: 0.0.40
codegen_flags: <defaults>
</compile_context>

<pallas_src>
import functools

import jax
import jax.numpy as jnp
from jax import lax
from jax.experimental import pallas as pl
from jax.experimental.pallas import tpu as pltpu

LANES = 128
SUBLANES = 8
MAX_BLOCK_ROWS = 8192          # (8192, 128) f32 = 4 MiB per input block


def _tile_rows(*dtypes):
    """Row granularity so (block_rows, 128) blocks satisfy TPU tiling.

    8 rows for 4-byte dtypes, 16 for 2-byte (bf16), 32 for 1-byte.
    """
    m = SUBLANES
    for dt in dtypes:
        m = max(m, 32 // max(jnp.dtype(dt).itemsize, 1))
    return m


def _sse_kernel(p_ref, t_ref, o_ref, acc_ref, *, rows, block_rows):
    """Sum of squared errors over a (rows, 128) slab, streamed in row blocks.

    acc_ref: (8, 128) f32 VMEM scratch, resident across the reduction grid.
    o_ref:   (1, 1) f32 SMEM scalar output, written on the last step only.
    """
    step = pl.program_id(0)
    num_steps = pl.num_programs(0)
    last = num_steps - 1

    d = p_ref[...].astype(jnp.float32) - t_ref[...].astype(jnp.float32)
    sq = d * d

    if block_rows % SUBLANES != 0:
        # Only possible when the whole slab is a single full-array block
        # (rows < 8 or rows not a multiple of 8); reduce straight to scalar.
        o_ref[0, 0] = jnp.sum(sq)
        return

    @pl.when(step == 0)
    def _init():
        acc_ref[...] = jnp.zeros_like(acc_ref)

    def _accumulate(x):
        # (block_rows, 128) -> (block_rows//8, 8, 128); summing the leading
        # axis is pure VALU work and keeps a single vreg-shaped accumulator.
        acc_ref[...] += jnp.sum(x.reshape(-1, SUBLANES, LANES), axis=0)

    rem_rows = rows % block_rows  # static: valid rows in the ragged last block
    if rem_rows == 0:
        _accumulate(sq)
    else:
        @pl.when(step < last)
        def _full():
            _accumulate(sq)

        @pl.when(step == last)
        def _ragged():
            # The last block's DMA is clamped to the array bounds; rows beyond
            # rem_rows hold stale garbage.  jnp.where is a select, so even
            # NaN/Inf garbage cannot leak into the sum.
            row_ids = lax.broadcasted_iota(jnp.int32, (block_rows, LANES), 0)
            _accumulate(jnp.where(row_ids < rem_rows, sq, 0.0))

    @pl.when(step == last)
    def _finalize():
        # In-kernel (8,128) -> scalar reduce: no partials written to HBM and
        # no separate XLA reduction kernel afterwards.
        o_ref[0, 0] = jnp.sum(acc_ref[...])


@functools.partial(jax.jit, static_argnames=("max_block_rows",))
def custom_loss(predictions, targets, *, max_block_rows=MAX_BLOCK_ROWS):
    """MSE loss: mean((predictions - targets) ** 2) -> scalar float32."""
    if predictions.shape != targets.shape:
        raise ValueError("predictions and targets must have identical shapes")
    n_total = predictions.size
    if n_total == 0:
        return jnp.float32(jnp.nan)

    p_flat = predictions.reshape(-1)   # free bitcast reshape
    t_flat = targets.reshape(-1)

    rem_lanes = n_total % LANES
    if rem_lanes:
        # Rare fallback: element count not divisible by 128.  Pad to the next
        # lane multiple; the zero padding contributes 0 to the SSE and the
        # divisor below uses the true element count.
        pad = LANES - rem_lanes
        p_flat = jnp.pad(p_flat, (0, pad))
        t_flat = jnp.pad(t_flat, (0, pad))
    rows = p_flat.size // LANES

    p2d = p_flat.reshape(rows, LANES)  # free reshape (contiguous, row-major)
    t2d = t_flat.reshape(rows, LANES)

    sub = _tile_rows(p2d.dtype, t2d.dtype)
    if rows <= max_block_rows:
        block_rows = rows              # single full-array block (always legal)
    else:
        block_rows = max(sub, (max_block_rows // sub) * sub)
    num_steps = pl.cdiv(rows, block_rows)

    kernel = functools.partial(_sse_kernel, rows=rows, block_rows=block_rows)
    in_spec = pl.BlockSpec((block_rows, LANES), lambda i: (i, 0))

    # Double-buffered input blocks + small slack; v5e's default scoped VMEM is
    # only 16 MiB, while v7x physical VMEM is 64 MiB -> cap well below that.
    block_bytes = block_rows * LANES * (p2d.dtype.itemsize + t2d.dtype.itemsize)
    vmem_limit = int(min(max(2 * block_bytes + (2 << 20), 16 << 20), 48 << 20))

    n_kernel = rows * LANES
    cost = pl.CostEstimate(
        flops=3 * n_kernel,
        transcendentals=0,
        bytes_accessed=n_kernel * (p2d.dtype.itemsize + t2d.dtype.itemsize) + 4,
    )

    sse = pl.pallas_call(
        kernel,
        out_shape=jax.ShapeDtypeStruct((1, 1), jnp.float32),
        grid_spec=pltpu.PrefetchScalarGridSpec(
            num_scalar_prefetch=0,
            grid=(num_steps,),
            in_specs=[in_spec, in_spec],
            out_specs=pl.BlockSpec(memory_space=pltpu.MemorySpace.SMEM),
            scratch_shapes=[pltpu.VMEM((SUBLANES, LANES), jnp.float32)],
        ),
        compiler_params=pltpu.CompilerParams(
            dimension_semantics=("arbitrary",),
            vmem_limit_bytes=vmem_limit,
        ),
        cost_estimate=cost,
    )(p2d, t2d)

    return sse[0, 0] * (1.0 / float(n_total))


class CustomLossFunction:
    """JAX/Pallas counterpart of the (underspecified) PyTorch module."""

    def __call__(self, predictions, targets):
        return custom_loss(predictions, targets)


if __name__ == "__main__":
    key = jax.random.PRNGKey(0)
    keys = jax.random.split(key, 8)

    def _ref(p, t):
        return jnp.mean((p.astype(jnp.float32) - t.astype(jnp.float32)) ** 2)

    loss_fn = CustomLossFunction()

    # 1) Canonical NCHW shape (lane-aligned, zero-copy single-block path).
    p = jax.random.normal(keys[0], (2, 4, 16, 16), dtype=jnp.float32)
    t = jax.random.normal(keys[1], (2, 4, 16, 16), dtype=jnp.float32)
    out = jax.block_until_ready(loss_fn(p, t))
    assert jnp.allclose(out, _ref(p, t), rtol=1e-5, atol=1e-6), (out, _ref(p, t))

    # 2) Element count not divisible by 128 (pad fallback path).
    p2 = jax.random.normal(keys[2], (3, 5, 7, 9), dtype=jnp.float32)
    t2 = jax.random.normal(keys[3], (3, 5, 7, 9), dtype=jnp.float32)
    out2 = jax.block_until_ready(custom_loss(p2, t2))
    assert jnp.allclose(out2, _ref(p2, t2), rtol=1e-5, atol=1e-6), (out2, _ref(p2, t2))

    # 3) Multi-step grid with a ragged (masked) final block.
    p3 = jax.random.normal(keys[4], (3, 4, 16, 16), dtype=jnp.float32)
    t3 = jax.random.normal(keys[5], (3, 4, 16, 16), dtype=jnp.float32)
    out3 = jax.block_until_ready(custom_loss(p3, t3, max_block_rows=16))
    assert jnp.allclose(out3, _ref(p3, t3), rtol=1e-5, atol=1e-6), (out3, _ref(p3, t3))

    # 4) Multi-step grid, evenly divided (no masking branch).
    out4 = jax.block_until_ready(custom_loss(p3, t3, max_block_rows=8))
    assert jnp.allclose(out4, _ref(p3, t3), rtol=1e-5, atol=1e-6), (out4, _ref(p3, t3))

    # 5) bf16 inputs stream at half the HBM bytes; upcast to f32 happens in-kernel.
    pb = p.astype(jnp.bfloat16)
    tb = t.astype(jnp.bfloat16)
    out5 = jax.block_until_ready(custom_loss(pb, tb))
    assert jnp.allclose(out5, _ref(pb, tb), rtol=1e-3, atol=1e-4), (out5, _ref(pb, tb))

    # 6) Row count not a multiple of 8 -> single-block direct scalar reduce path.
    p6 = jax.random.normal(keys[6], (9, 128), dtype=jnp.float32)
    t6 = jax.random.normal(keys[7], (9, 128), dtype=jnp.float32)
    out6 = jax.block_until_ready(custom_loss(p6, t6))
    assert jnp.allclose(out6, _ref(p6, t6), rtol=1e-5, atol=1e-6), (out6, _ref(p6, t6))

    print("KERNEL_OK")
</pallas_src>

<mosaic_0001>
module attributes {stable_mosaic.version = 11 : i64} {
  func.func @_sse_kernel(%arg0: i32, %arg1: memref<16x128xf32, #tpu.memory_space<vmem>>, %arg2: memref<16x128xf32, #tpu.memory_space<vmem>>, %arg3: memref<1x1xf32, #tpu.memory_space<smem>>, %arg4: memref<8x128xf32, #tpu.memory_space<vmem>>) attributes {dimension_semantics = [#tpu.dimension_semantics<arbitrary>], iteration_bounds = array<i64: 1>, scalar_prefetch = 0 : i64, scratch_operands = 1 : i64, tpu.core_type = #tpu.core_type<tc>, window_params = [{transform_indices = @transform_0, window_bounds = array<i64: 16, 128>}, {transform_indices = @transform_1, window_bounds = array<i64: 16, 128>}, {transform_indices = @transform_2, window_bounds = array<i64: 1, 1>}]} {
    %c0 = arith.constant 0 : index
    %c0_0 = arith.constant 0 : index
    %0 = vector.load %arg1[%c0, %c0_0] : memref<16x128xf32, #tpu.memory_space<vmem>>, vector<16x128xf32>
    %c0_1 = arith.constant 0 : index
    %c0_2 = arith.constant 0 : index
    %1 = vector.load %arg2[%c0_1, %c0_2] : memref<16x128xf32, #tpu.memory_space<vmem>>, vector<16x128xf32>
    %2 = arith.subf %0, %1 : vector<16x128xf32>
    %3 = arith.mulf %2, %2 : vector<16x128xf32>
    %c0_i32 = arith.constant 0 : i32
    %4 = arith.cmpi eq, %arg0, %c0_i32 : i32
    %5 = arith.extui %4 : i1 to i32
    %c0_i32_3 = arith.constant 0 : i32
    %6 = arith.cmpi ne, %5, %c0_i32_3 : i32
    scf.if %6 {
      %cst_10 = arith.constant 0.000000e+00 : f32
      %15 = vector.broadcast %cst_10 : f32 to vector<8x128xf32>
      %c0_11 = arith.constant 0 : index
      %c0_12 = arith.constant 0 : index
      %16 = vector.load %arg4[%c0_11, %c0_12] : memref<8x128xf32, #tpu.memory_space<vmem>>, vector<8x128xf32>
      tpu.vector_store %arg4[%c0_11, %c0_12], %15 {strides = array<i32>} : memref<8x128xf32, #tpu.memory_space<vmem>>, vector<8x128xf32>,
    } else {
    }
    %c0_4 = arith.constant 0 : index
    %c0_5 = arith.constant 0 : index
    %7 = vector.load %arg4[%c0_4, %c0_5] : memref<8x128xf32, #tpu.memory_space<vmem>>, vector<8x128xf32>
    %8 = vector.shape_cast %3 : vector<16x128xf32> to vector<2x8x128xf32>
    %cst = arith.constant dense<0.000000e+00> : vector<8x128xf32>
    %9 = vector.multi_reduction <add>, %8, %cst [0] : vector<2x8x128xf32> to vector<8x128xf32>
    %10 = arith.addf %7, %9 : vector<8x128xf32>
    %c0_6 = arith.constant 0 : index
    %c0_7 = arith.constant 0 : index
    %11 = vector.load %arg4[%c0_6, %c0_7] : memref<8x128xf32, #tpu.memory_space<vmem>>, vector<8x128xf32>
    tpu.vector_store %arg4[%c0_6, %c0_7], %10 {strides = array<i32>} : memref<8x128xf32, #tpu.memory_space<vmem>>, vector<8x128xf32>,
    %c0_i32_8 = arith.constant 0 : i32
    %12 = arith.cmpi eq, %arg0, %c0_i32_8 : i32
    %13 = arith.extui %12 : i1 to i32
    %c0_i32_9 = arith.constant 0 : i32
    %14 = arith.cmpi ne, %13, %c0_i32_9 : i32
    scf.if %14 {
      %c0_10 = arith.constant 0 : index
      %c0_11 = arith.constant 0 : index
      %15 = vector.load %arg4[%c0_10, %c0_11] : memref<8x128xf32, #tpu.memory_space<vmem>>, vector<8x128xf32>
      %16 = vector.shape_cast %15 : vector<8x128xf32> to vector<1x8x128xf32>
      %cst_12 = arith.constant dense<0.000000e+00> : vector<1xf32>
      %17 = vector.multi_reduction <add>, %16, %cst_12 [1, 2] : vector<1x8x128xf32> to vector<1xf32>
      %18 = vector.shape_cast %17 : vector<1xf32> to vector<1x1x1xf32>
      %19 = vector.extract %18[0, 0, 0] : f32 from vector<1x1x1xf32>
      %c0_13 = arith.constant 0 : index
      %c0_14 = arith.constant 0 : index
      %20 = memref.load %arg3[%c0_13, %c0_14] : memref<1x1xf32, #tpu.memory_space<smem>>
      memref.store %19, %arg3[%c0_13, %c0_14] : memref<1x1xf32, #tpu.memory_space<smem>>
    } else {
    }
    return
  }
  func.func @transform_0(%arg0: i32) -> (i32, i32) {
    %c0_i32 = arith.constant 0 : i32
    %c0_i32_0 = arith.constant 0 : i32
    return %arg0, %c0_i32 : i32, i32
  }
  func.func @transform_1(%arg0: i32) -> (i32, i32) {
    %c0_i32 = arith.constant 0 : i32
    %c0_i32_0 = arith.constant 0 : i32
    return %arg0, %c0_i32 : i32, i32
  }
  func.func @transform_2(%arg0: i32) -> (i32, i32) {
    %c0_i32 = arith.constant 0 : i32
    %c0_i32_0 = arith.constant 0 : i32
    %c0_i32_1 = arith.constant 0 : i32
    return %c0_i32, %c0_i32_0 : i32, i32
  }
}

</mosaic_0001>

<bundles_post_ra>
// kernel: custom_loss.1
= control target key start
LH: loop header
LB: loop body
LE: loop exit
PB: predicated region body
PF: predicated region fallthrough
CT: control target
= control target key end

     0   :  { %s112_s0 = inlined_call_operand.vmem [shape: f32[16,128], index: 0, kind: input, shape index: {}]   ;;  %s113_s1 = inlined_call_operand.vmem [shape: f32[16,128], index: 1, kind: input, shape index: {}]   ;;  %s114_s2 = inlined_call_operand.hbm [shape: f32[1,1], index: 2, kind: output, shape index: {}]  }
   0x1   :  { %v12_v0 = vld [vmem:[%s112_s0] sm:$0xff]  ;;  %v13_v1 = vld [vmem:[%s112_s0 + $0x8] sm:$0xff] }
   0x2   :  { %v14_v2 = vld [vmem:[%s113_s1] sm:$0xff]  ;;  %v15_v3 = vld [vmem:[%s113_s1 + $0x8] sm:$0xff] }
   0x3   :  { %v16_v4 = vsub.f32 %v12_v0, %v14_v2 }
   0x4   :  { %7 = vsyncpa [#allocation4], 0  ;;  %v17_v5 = vsub.f32 %v13_v1, %v15_v3  ;;  %s60_s1 = scalar_lea.hbm %s114_s2, 16 }
   0x5   :  { %v18_v6 = vmul.f32 %v16_v4, %v16_v4  ;;  %p61_p0 = scmp.ne.s32.totalorder %s114_s2, %s60_s1  ;;  %p64_p1 = scmp.lt.u32.totalorder %s60_s1, %s114_s2 }
   0x6   :  { %v19_v7 = vmul.f32 %v17_v5, %v17_v5 }
   0x7   :  { %p66_p2 = pnand %p64_p1, %p61_p0 }
   0x8   :  { %v26_v8 = vadd.f32 %v19_v7, %v18_v6 }
   0xa   :  { %33 = vadd.xlane.f32.xlu0 %v26_v8 }
  0x97   :  { %v34_v9 = vpop.xlane.xlu0 %33 }
  0x98   :  { %v35_v10 = vrot.slane %v34_v9, 4 }
  0x9a   :  { %v36_v11 = vadd.f32 %v35_v10, %v34_v9 }
  0x9c   :  { %v37_v12 = vrot.slane %v36_v11, 2 }
  0x9e   :  { %v38_v13 = vadd.f32 %v37_v12, %v36_v11 }
  0xa0   :  { %v39_v14 = vrot.slane %v38_v13, 1 }
  0xa2   :  { %v40_v15 = vadd.f32 %v39_v14, %v38_v13 }
  0xa4   :  { %57 = vpush %v40_v15 }
  0xd5   :  { %s58_s0 = spop %57 }
  0xd6   :  { %43 = sst [smem:[#allocation3]] %s58_s0 }
  0xd7   :  { %69 = shalt.err (!%p66_p2)
}
  0xd8   :  { %s72_s23 = smov [#allocation3]  }
  0xd9   :  { %51 = dma.smem_to_hbm %s72_s23, 16, %s114_s2, [#allocation4]  }
  0xda   :  { %70 = dma.done.wait [#allocation4], 16  }
  0xdb   :  { %71 = vsyncadd [#allocation4], 4294967280 }
  0xdc   :  { %55 = sfence }
  0xdd   :  { %56 = vsyncpa [#allocation4], 1 }

</bundles_post_ra>
